<compile_context>
chip_gen: v7x
topology: tpu7x:2x2x1
jax: 0.10.0
libtpu: 0.0.40
codegen_flags: <defaults>
</compile_context>

<pallas_src>
import functools

import jax
import jax.numpy as jnp
from jax.experimental import pallas as pl
from jax.experimental.pallas import tpu as pltpu

EPS = 1e-5


def _round_up(a, b):
    return ((a + b - 1) // b) * b


def _round_down(a, b):
    return (a // b) * b


def _sublane_multiple(dtype):
    itemsize = jnp.dtype(dtype).itemsize
    if itemsize >= 4:
        return 8
    if itemsize == 2:
        return 16
    return 32


def _default_vmem_limit():
    # Generation-aware: leave ~16 MiB headroom for compiler-internal scratch.
    # v5e/v6e (128 MiB physical) -> ~112 MiB; v7x (64 MiB) -> ~48 MiB.
    try:
        cap = int(pltpu.get_tpu_info().vmem_capacity_bytes)
    except Exception:
        return 64 << 20
    return max(32 << 20, cap - (16 << 20))


def _ln_into_scratch(residual, gamma_ref, beta_ref, normed_ref, d_real, d_pad):
    """LayerNorm (fp32 stats) of one (tm, Dp) tile, written to VMEM scratch."""
    x = residual.astype(jnp.float32)
    inv_d = jnp.float32(1.0 / d_real)
    mean = jnp.sum(x, axis=-1, keepdims=True) * inv_d
    centered = x - mean
    sq = jnp.sum(centered * centered, axis=-1, keepdims=True)
    if d_pad:
        # Padded lanes of x are zero, so (0 - mean)^2 contributes exactly
        # d_pad * mean^2; subtracting it keeps the two-pass variance exact.
        sq = sq - jnp.float32(d_pad) * mean * mean
    var = sq * inv_d
    normed = centered * jax.lax.rsqrt(var + EPS)
    normed = (normed * gamma_ref[...].astype(jnp.float32)
              + beta_ref[...].astype(jnp.float32))
    normed_ref[...] = normed.astype(normed_ref.dtype)


def _block_kernel(h_ref, r_ref, gamma_ref, beta_ref, w_ref, b_ref,
                  h_out_ref, r_out_ref, normed_ref, *, d_real, d_pad):
    j = pl.program_id(1)

    @pl.when(j == 0)
    def _():
        # residual = drop_path(hidden) + residual   (drop_path == Identity)
        residual = h_ref[...] + r_ref[...]
        r_out_ref[...] = residual.astype(r_out_ref.dtype)
        _ln_into_scratch(residual, gamma_ref, beta_ref, normed_ref, d_real, d_pad)

    # Mixer: Linear(D, D) column tile.  MXU runs at the weight dtype; fp32 acc.
    y = jnp.dot(normed_ref[...], w_ref[...], preferred_element_type=jnp.float32)
    h_out_ref[...] = (y + b_ref[...].astype(jnp.float32)).astype(h_out_ref.dtype)


def _block_kernel_first(h_ref, gamma_ref, beta_ref, w_ref, b_ref,
                        h_out_ref, r_out_ref, normed_ref, *, d_real, d_pad):
    j = pl.program_id(1)

    @pl.when(j == 0)
    def _():
        # residual is None  ->  residual := hidden_states (no zeros read)
        residual = h_ref[...]
        r_out_ref[...] = residual.astype(r_out_ref.dtype)
        _ln_into_scratch(residual, gamma_ref, beta_ref, normed_ref, d_real, d_pad)

    y = jnp.dot(normed_ref[...], w_ref[...], preferred_element_type=jnp.float32)
    h_out_ref[...] = (y + b_ref[...].astype(jnp.float32)).astype(h_out_ref.dtype)


def block_forward(hidden_states, residual, gamma, beta, w_in_out, bias,
                  *, tile_m=None, tile_n=None, vmem_limit_bytes=None):
    """Fused add + LayerNorm + Linear(dim, dim).

    hidden_states: (B, L, D); residual: (B, L, D) or None.
    Returns (hidden_out, residual_out), both in hidden_states.dtype.
    """
    B, L, D = hidden_states.shape
    M = B * L
    out_dtype = hidden_states.dtype
    act_bytes = jnp.dtype(out_dtype).itemsize
    w_dtype = w_in_out.dtype
    w_bytes = jnp.dtype(w_dtype).itemsize
    sub = _sublane_multiple(out_dtype)

    if vmem_limit_bytes is None:
        vmem_limit_bytes = _default_vmem_limit()

    # ---- lane (D) sizing: pad only when D is not a multiple of 128 ---------
    Dp = _round_up(D, 128)
    pad_d = Dp - D

    # ---- tile selection -----------------------------------------------------
    budget = int(vmem_limit_bytes * 0.75)          # headroom for temporaries
    if tile_n is None:
        if Dp * Dp * w_bytes <= budget // 2:
            tn = Dp                                # keep the weight resident
        else:
            # Weight too big to keep resident (e.g. v7x large D): column-tile.
            tn = _round_down(max(budget // 2 // (2 * Dp * w_bytes), 1), 128)
            tn = max(128, min(tn, Dp))
    else:
        tn = max(128, min(_round_up(tile_n, 128), Dp))
    n_col = pl.cdiv(Dp, tn)
    w_vmem = Dp * tn * w_bytes * (1 if n_col == 1 else 2)

    if tile_m is None:
        n_row_streams = 3 if residual is None else 4   # h, (r), r_out (dbl-buf)
        per_row = (n_row_streams * 2 * Dp * act_bytes
                   + 2 * tn * act_bytes                # h_out tile (dbl-buf)
                   + Dp * w_bytes                      # normed scratch
                   + 2 * Dp * 4)                       # fp32 LN temporaries
        tm = max(sub, (budget - w_vmem) // per_row)
        tm = min(tm, 1024)
    else:
        tm = tile_m
    tm = _round_up(max(tm, sub), sub)                  # dtype-native sublanes
    tm = min(tm, _round_up(M, sub))
    # v7x megacore: make sure the "parallel" row axis has >= 2 steps.
    if M >= 2 * sub and pl.cdiv(M, tm) < 2:
        tm = _round_up(pl.cdiv(M, 2), sub)

    # ---- host-side padding only when unavoidable ----------------------------
    h2 = hidden_states.reshape(M, D)
    r2 = None if residual is None else residual.reshape(M, D)
    pad_m = tm - M if tm > M else 0        # only for tiny M; ragged M handled in-kernel
    if pad_m or pad_d:
        h2 = jnp.pad(h2, ((0, pad_m), (0, pad_d)))
        if r2 is not None:
            r2 = jnp.pad(r2, ((0, pad_m), (0, pad_d)))
    Mp = M + pad_m

    gamma2 = gamma.reshape(1, D)
    beta2 = beta.reshape(1, D)
    bias2 = bias.reshape(1, D)
    w2 = w_in_out
    if pad_d:
        gamma2 = jnp.pad(gamma2, ((0, 0), (0, pad_d)))
        beta2 = jnp.pad(beta2, ((0, 0), (0, pad_d)))
        bias2 = jnp.pad(bias2, ((0, 0), (0, pad_d)))
        w2 = jnp.pad(w2, ((0, pad_d), (0, pad_d)))

    # ---- grid & block specs --------------------------------------------------
    grid = (pl.cdiv(Mp, tm), n_col)

    single = pl.Buffered(buffer_count=1)
    row_in_spec = pl.BlockSpec((tm, Dp), lambda i, j: (i, 0))
    vec_full_spec = pl.BlockSpec((1, Dp), lambda i, j: (0, 0), pipeline_mode=single)
    if n_col == 1:
        w_spec = pl.BlockSpec((Dp, tn), lambda i, j: (0, 0), pipeline_mode=single)
        bias_spec = pl.BlockSpec((1, tn), lambda i, j: (0, 0), pipeline_mode=single)
    else:
        w_spec = pl.BlockSpec((Dp, tn), lambda i, j: (0, j))
        bias_spec = pl.BlockSpec((1, tn), lambda i, j: (0, j))
    h_out_spec = pl.BlockSpec((tm, tn), lambda i, j: (i, j))
    r_out_spec = pl.BlockSpec((tm, Dp), lambda i, j: (i, 0))

    if residual is None:
        kernel = functools.partial(_block_kernel_first, d_real=D, d_pad=pad_d)
        in_specs = [row_in_spec, vec_full_spec, vec_full_spec, w_spec, bias_spec]
        args = (h2, gamma2, beta2, w2, bias2)
        n_act_streams = 3
    else:
        kernel = functools.partial(_block_kernel, d_real=D, d_pad=pad_d)
        in_specs = [row_in_spec, row_in_spec, vec_full_spec, vec_full_spec,
                    w_spec, bias_spec]
        args = (h2, r2, gamma2, beta2, w2, bias2)
        n_act_streams = 4

    cost = pl.CostEstimate(
        flops=2 * M * D * D,
        transcendentals=M,
        bytes_accessed=n_act_streams * M * D * act_bytes + D * D * w_bytes)

    h_out, r_out = pl.pallas_call(
        kernel,
        out_shape=(jax.ShapeDtypeStruct((Mp, Dp), out_dtype),
                   jax.ShapeDtypeStruct((Mp, Dp), out_dtype)),
        grid_spec=pltpu.PrefetchScalarGridSpec(
            num_scalar_prefetch=0,
            grid=grid,
            in_specs=in_specs,
            out_specs=[h_out_spec, r_out_spec],
            scratch_shapes=[pltpu.VMEM((tm, Dp), w_dtype)],
        ),
        compiler_params=pltpu.CompilerParams(
            dimension_semantics=("parallel", "arbitrary"),
            vmem_limit_bytes=int(vmem_limit_bytes)),
        cost_estimate=cost,
    )(*args)

    if pad_m or pad_d:
        h_out = h_out[:M, :D]
        r_out = r_out[:M, :D]
    return h_out.reshape(B, L, D), r_out.reshape(B, L, D)


def _reference(hidden_states, residual, gamma, beta, w_in_out, bias):
    res = hidden_states if residual is None else hidden_states + residual
    x = res.astype(jnp.float32)
    mean = jnp.mean(x, axis=-1, keepdims=True)
    var = jnp.var(x, axis=-1, keepdims=True)
    normed = (x - mean) / jnp.sqrt(var + EPS)
    normed = normed * gamma.astype(jnp.float32) + beta.astype(jnp.float32)
    y = jnp.einsum("bld,de->ble", normed.astype(w_in_out.dtype), w_in_out,
                   preferred_element_type=jnp.float32)
    out = (y + bias.astype(jnp.float32)).astype(hidden_states.dtype)
    return out, res


if __name__ == "__main__":
    B, L, D = 2, 8, 32
    key = jax.random.PRNGKey(0)
    k1, k2, k3, k4, k5, k6 = jax.random.split(key, 6)

    hidden = jax.random.normal(k1, (B, L, D), dtype=jnp.float32)
    residual = jax.random.normal(k2, (B, L, D), dtype=jnp.float32)

    # LayerNorm params (PyTorch init: gamma=1, beta=0)
    gamma = jnp.ones((D,), dtype=jnp.float32)
    beta = jnp.zeros((D,), dtype=jnp.float32)

    # Mixer = Linear(D, D): weight stored as (in, out); bias (D,)
    w_in_out = (jax.random.normal(k3, (D, D), dtype=jnp.float32)
                * (1.0 / jnp.sqrt(D)))
    bias = jax.random.normal(k4, (D, ), dtype=jnp.float32) * 0.01

    # case 1: f32, with residual (auto tiles, lane-padded D, >=2 row steps)
    h_out, r_out = block_forward(hidden, residual, gamma, beta, w_in_out, bias)
    jax.block_until_ready((h_out, r_out))
    h_ref, r_ref = _reference(hidden, residual, gamma, beta, w_in_out, bias)
    assert jnp.allclose(h_out, h_ref, atol=5e-4, rtol=5e-4)
    assert jnp.allclose(r_out, r_ref, atol=1e-6, rtol=1e-6)

    # case 2: f32, residual is None (first block) -> no zeros tensor is read
    h_out2, r_out2 = block_forward(hidden, None, gamma, beta, w_in_out, bias)
    jax.block_until_ready((h_out2, r_out2))
    h_ref2, r_ref2 = _reference(hidden, None, gamma, beta, w_in_out, bias)
    assert jnp.allclose(h_out2, h_ref2, atol=5e-4, rtol=5e-4)
    assert jnp.allclose(r_out2, r_ref2, atol=1e-6, rtol=1e-6)

    # case 3: bf16 activations + bf16 weights (bf16 MXU path, bf16 outputs),
    # tiny ragged row count (pads a handful of rows only).
    Bb, Lb = 2, 5
    hb = jax.random.normal(k1, (Bb, Lb, D), dtype=jnp.float32).astype(jnp.bfloat16)
    rb = jax.random.normal(k2, (Bb, Lb, D), dtype=jnp.float32).astype(jnp.bfloat16)
    wb = w_in_out.astype(jnp.bfloat16)
    bb = bias.astype(jnp.bfloat16)
    h_out3, r_out3 = block_forward(hb, rb, gamma, beta, wb, bb, tile_m=8)
    jax.block_until_ready((h_out3, r_out3))
    assert h_out3.dtype == jnp.bfloat16 and r_out3.dtype == jnp.bfloat16
    h_ref3, r_ref3 = _reference(hb, rb, gamma, beta, wb, bb)
    assert jnp.allclose(h_out3.astype(jnp.float32), h_ref3.astype(jnp.float32),
                        atol=2e-2, rtol=2e-2)
    assert jnp.allclose(r_out3.astype(jnp.float32), r_ref3.astype(jnp.float32),
                        atol=2e-2, rtol=2e-2)

    # case 4: D multiple of 128 (no padding at all), ragged rows handled by
    # cdiv grid masking, and forced output-column tiling (tile_n=128) so the
    # LayerNorm-scratch reuse across column tiles is exercised on hardware.
    Bc, Lc, Dc = 2, 15, 256
    hc = jax.random.normal(k1, (Bc, Lc, Dc), dtype=jnp.float32)
    rc = jax.random.normal(k2, (Bc, Lc, Dc), dtype=jnp.float32)
    gc = 1.0 + 0.1 * jax.random.normal(k5, (Dc,), dtype=jnp.float32)
    bc = 0.1 * jax.random.normal(k6, (Dc,), dtype=jnp.float32)
    wc = (jax.random.normal(k3, (Dc, Dc), dtype=jnp.float32)
          * (1.0 / jnp.sqrt(Dc)))
    bbc = jax.random.normal(k4, (Dc,), dtype=jnp.float32) * 0.01
    h_out4, r_out4 = block_forward(hc, rc, gc, bc, wc, bbc,
                                   tile_m=8, tile_n=128)
    jax.block_until_ready((h_out4, r_out4))
    h_ref4, r_ref4 = _reference(hc, rc, gc, bc, wc, bbc)
    assert jnp.allclose(h_out4, h_ref4, atol=1e-3, rtol=1e-3)
    assert jnp.allclose(r_out4, r_ref4, atol=1e-6, rtol=1e-6)

    print("KERNEL_OK")
</pallas_src>

<mosaic_0001>
module attributes {stable_mosaic.version = 11 : i64} {
  func.func @_block_kernel(%arg0: i32, %arg1: i32, %arg2: memref<8x128xf32, #tpu.memory_space<vmem>>, %arg3: memref<8x128xf32, #tpu.memory_space<vmem>>, %arg4: memref<1x128xf32, #tpu.memory_space<vmem>>, %arg5: memref<1x128xf32, #tpu.memory_space<vmem>>, %arg6: memref<128x128xf32, #tpu.memory_space<vmem>>, %arg7: memref<1x128xf32, #tpu.memory_space<vmem>>, %arg8: memref<8x128xf32, #tpu.memory_space<vmem>>, %arg9: memref<8x128xf32, #tpu.memory_space<vmem>>, %arg10: memref<8x128xf32, #tpu.memory_space<vmem>>) attributes {dimension_semantics = [#tpu.dimension_semantics<parallel>, #tpu.dimension_semantics<arbitrary>], iteration_bounds = array<i64: 2, 1>, scalar_prefetch = 0 : i64, scratch_operands = 1 : i64, tpu.core_type = #tpu.core_type<tc>, window_params = [{transform_indices = @transform_0, window_bounds = array<i64: 8, 128>}, {transform_indices = @transform_1, window_bounds = array<i64: 8, 128>}, {pipeline_mode = #tpu.pipeline_mode<synchronous>, transform_indices = @transform_2, window_bounds = array<i64: 1, 128>}, {pipeline_mode = #tpu.pipeline_mode<synchronous>, transform_indices = @transform_3, window_bounds = array<i64: 1, 128>}, {pipeline_mode = #tpu.pipeline_mode<synchronous>, transform_indices = @transform_4, window_bounds = array<i64: 128, 128>}, {pipeline_mode = #tpu.pipeline_mode<synchronous>, transform_indices = @transform_5, window_bounds = array<i64: 1, 128>}, {transform_indices = @transform_6, window_bounds = array<i64: 8, 128>}, {transform_indices = @transform_7, window_bounds = array<i64: 8, 128>}]} {
    %c0_i32 = arith.constant 0 : i32
    %0 = arith.cmpi eq, %arg1, %c0_i32 : i32
    %1 = arith.extui %0 : i1 to i32
    %c0_i32_0 = arith.constant 0 : i32
    %2 = arith.cmpi ne, %1, %c0_i32_0 : i32
    scf.if %2 {
      %c0_8 = arith.constant 0 : index
      %c0_9 = arith.constant 0 : index
      %10 = vector.load %arg2[%c0_8, %c0_9] : memref<8x128xf32, #tpu.memory_space<vmem>>, vector<8x128xf32>
      %c0_10 = arith.constant 0 : index
      %c0_11 = arith.constant 0 : index
      %11 = vector.load %arg3[%c0_10, %c0_11] : memref<8x128xf32, #tpu.memory_space<vmem>>, vector<8x128xf32>
      %12 = arith.addf %10, %11 : vector<8x128xf32>
      %c0_12 = arith.constant 0 : index
      %c0_13 = arith.constant 0 : index
      %13 = vector.load %arg9[%c0_12, %c0_13] : memref<8x128xf32, #tpu.memory_space<vmem>>, vector<8x128xf32>
      tpu.vector_store %arg9[%c0_12, %c0_13], %12 {strides = array<i32>} : memref<8x128xf32, #tpu.memory_space<vmem>>, vector<8x128xf32>,
      %cst_14 = arith.constant dense<0.000000e+00> : vector<8xf32>
      %14 = vector.multi_reduction <add>, %12, %cst_14 [1] : vector<8x128xf32> to vector<8xf32>
      %15 = vector.shape_cast %14 : vector<8xf32> to vector<8x1xf32>
      %cst_15 = arith.constant 3.125000e-02 : f32
      %16 = vector.broadcast %cst_15 : f32 to vector<8x1xf32>
      %17 = arith.mulf %15, %16 : vector<8x1xf32>
      %18 = vector.broadcast %17 : vector<8x1xf32> to vector<8x128xf32>
      %19 = arith.subf %12, %18 : vector<8x128xf32>
      %20 = arith.mulf %19, %19 : vector<8x128xf32>
      %cst_16 = arith.constant dense<0.000000e+00> : vector<8xf32>
      %21 = vector.multi_reduction <add>, %20, %cst_16 [1] : vector<8x128xf32> to vector<8xf32>
      %22 = vector.shape_cast %21 : vector<8xf32> to vector<8x1xf32>
      %cst_17 = arith.constant 9.600000e+01 : f32
      %23 = vector.broadcast %cst_17 : f32 to vector<8x1xf32>
      %24 = arith.mulf %23, %17 : vector<8x1xf32>
      %25 = arith.mulf %24, %17 : vector<8x1xf32>
      %26 = arith.subf %22, %25 : vector<8x1xf32>
      %cst_18 = arith.constant 3.125000e-02 : f32
      %27 = vector.broadcast %cst_18 : f32 to vector<8x1xf32>
      %28 = arith.mulf %26, %27 : vector<8x1xf32>
      %cst_19 = arith.constant 9.99999974E-6 : f32
      %29 = vector.broadcast %cst_19 : f32 to vector<8x1xf32>
      %30 = arith.addf %28, %29 : vector<8x1xf32>
      %31 = math.rsqrt %30 : vector<8x1xf32>
      %32 = vector.broadcast %31 : vector<8x1xf32> to vector<8x128xf32>
      %33 = arith.mulf %19, %32 : vector<8x128xf32>
      %c0_20 = arith.constant 0 : index
      %c0_21 = arith.constant 0 : index
      %34 = vector.load %arg4[%c0_20, %c0_21] : memref<1x128xf32, #tpu.memory_space<vmem>>, vector<1x128xf32>
      %35 = vector.broadcast %34 : vector<1x128xf32> to vector<8x128xf32>
      %36 = arith.mulf %33, %35 : vector<8x128xf32>
      %c0_22 = arith.constant 0 : index
      %c0_23 = arith.constant 0 : index
      %37 = vector.load %arg5[%c0_22, %c0_23] : memref<1x128xf32, #tpu.memory_space<vmem>>, vector<1x128xf32>
      %38 = vector.broadcast %37 : vector<1x128xf32> to vector<8x128xf32>
      %39 = arith.addf %36, %38 : vector<8x128xf32>
      %c0_24 = arith.constant 0 : index
      %c0_25 = arith.constant 0 : index
      %40 = vector.load %arg10[%c0_24, %c0_25] : memref<8x128xf32, #tpu.memory_space<vmem>>, vector<8x128xf32>
      tpu.vector_store %arg10[%c0_24, %c0_25], %39 {strides = array<i32>} : memref<8x128xf32, #tpu.memory_space<vmem>>, vector<8x128xf32>,
    } else {
    }
    %c0 = arith.constant 0 : index
    %c0_1 = arith.constant 0 : index
    %3 = vector.load %arg10[%c0, %c0_1] : memref<8x128xf32, #tpu.memory_space<vmem>>, vector<8x128xf32>
    %c0_2 = arith.constant 0 : index
    %c0_3 = arith.constant 0 : index
    %4 = vector.load %arg6[%c0_2, %c0_3] : memref<128x128xf32, #tpu.memory_space<vmem>>, vector<128x128xf32>
    %cst = arith.constant dense<0.000000e+00> : vector<8x128xf32>
    %5 = tpu.matmul %3, %4, %cst {dimension_numbers = #tpu.dot_dimension_numbers<[1], [0], [0], [1], [0, 0, 1, 1], [], []>} : vector<8x128xf32>, vector<128x128xf32>, vector<8x128xf32> -> vector<8x128xf32>
    %c0_4 = arith.constant 0 : index
    %c0_5 = arith.constant 0 : index
    %6 = vector.load %arg7[%c0_4, %c0_5] : memref<1x128xf32, #tpu.memory_space<vmem>>, vector<1x128xf32>
    %7 = vector.broadcast %6 : vector<1x128xf32> to vector<8x128xf32>
    %8 = arith.addf %5, %7 : vector<8x128xf32>
    %c0_6 = arith.constant 0 : index
    %c0_7 = arith.constant 0 : index
    %9 = vector.load %arg8[%c0_6, %c0_7] : memref<8x128xf32, #tpu.memory_space<vmem>>, vector<8x128xf32>
    tpu.vector_store %arg8[%c0_6, %c0_7], %8 {strides = array<i32>} : memref<8x128xf32, #tpu.memory_space<vmem>>, vector<8x128xf32>,
    return
  }
  func.func @transform_0(%arg0: i32, %arg1: i32) -> (i32, i32) {
    %c0_i32 = arith.constant 0 : i32
    %c0_i32_0 = arith.constant 0 : i32
    return %arg0, %c0_i32 : i32, i32
  }
  func.func @transform_1(%arg0: i32, %arg1: i32) -> (i32, i32) {
    %c0_i32 = arith.constant 0 : i32
    %c0_i32_0 = arith.constant 0 : i32
    return %arg0, %c0_i32 : i32, i32
  }
  func.func @transform_2(%arg0: i32, %arg1: i32) -> (i32, i32) {
    %c0_i32 = arith.constant 0 : i32
    %c0_i32_0 = arith.constant 0 : i32
    %c0_i32_1 = arith.constant 0 : i32
    return %c0_i32, %c0_i32_0 : i32, i32
  }
  func.func @transform_3(%arg0: i32, %arg1: i32) -> (i32, i32) {
    %c0_i32 = arith.constant 0 : i32
    %c0_i32_0 = arith.constant 0 : i32
    %c0_i32_1 = arith.constant 0 : i32
    return %c0_i32, %c0_i32_0 : i32, i32
  }
  func.func @transform_4(%arg0: i32, %arg1: i32) -> (i32, i32) {
    %c0_i32 = arith.constant 0 : i32
    %c0_i32_0 = arith.constant 0 : i32
    %c0_i32_1 = arith.constant 0 : i32
    return %c0_i32, %c0_i32_0 : i32, i32
  }
  func.func @transform_5(%arg0: i32, %arg1: i32) -> (i32, i32) {
    %c0_i32 = arith.constant 0 : i32
    %c0_i32_0 = arith.constant 0 : i32
    %c0_i32_1 = arith.constant 0 : i32
    return %c0_i32, %c0_i32_0 : i32, i32
  }
  func.func @transform_6(%arg0: i32, %arg1: i32) -> (i32, i32) {
    %c0_i32 = arith.constant 0 : i32
    return %arg0, %arg1 : i32, i32
  }
  func.func @transform_7(%arg0: i32, %arg1: i32) -> (i32, i32) {
    %c0_i32 = arith.constant 0 : i32
    %c0_i32_0 = arith.constant 0 : i32
    return %arg0, %c0_i32 : i32, i32
  }
}

</mosaic_0001>

<bundles_post_ra>
// kernel: tpu_custom_call.1
= control target key start
LH: loop header
LB: loop body
LE: loop exit
PB: predicated region body
PF: predicated region fallthrough
CT: control target
= control target key end

     0   :  { %s1695_s0 = inlined_call_operand.hbm [shape: f32[16,128], index: 0, kind: input, shape index: {}]   ;;  %s1696_s1 = inlined_call_operand.hbm [shape: f32[16,128], index: 1, kind: input, shape index: {}]   ;;  %s1697_s2 = inlined_call_operand.hbm [shape: f32[1,128], index: 2, kind: input, shape index: {}]   ;;  %s1698_s3 = inlined_call_operand.hbm [shape: f32[1,128], index: 3, kind: input, shape index: {}]   ;;  %s1699_s4 = inlined_call_operand.hbm [shape: f32[128,128], index: 4, kind: input, shape index: {}]   ;;  %s1700_s5 = inlined_call_operand.hbm [shape: f32[1,128], index: 5, kind: input, shape index: {}]   ;;  %s1701_s6 = inlined_call_operand.hbm [shape: f32[16,128], index: 6, kind: output, shape index: {0}]   ;;  %s1702_s7 = inlined_call_operand.hbm [shape: f32[16,128], index: 7, kind: output, shape index: {1}]  }
   0x1   :  { %1709 = sst [smem:[#allocation26_spill]] %s1697_s2 }
   0x2   :  { %1710 = sst [smem:[#allocation27_spill]] %s1698_s3 }
   0x3   :  { %1711 = sst [smem:[#allocation28_spill]] %s1699_s4 }
   0x4   :  { %1712 = sst [smem:[#allocation29_spill]] %s1700_s5 }
   0x5   :  { %13 = vsyncpa [#allocation4], 0 }
   0x6   :  { %15 = vsyncpa [#allocation4 + $0x1], 0 }
   0x7   :  { %16 = vsyncpa [#allocation7], 0 }
   0x8   :  { %18 = vsyncpa [#allocation7 + $0x1], 0 }
   0x9   :  { %19 = vsyncpa [#allocation10], 0 }
   0xa   :  { %20 = vsyncpa [#allocation13], 0 }
   0xb   :  { %21 = vsyncpa [#allocation5], 0 }
   0xc   :  { %23 = vsyncpa [#allocation5 + $0x1], 0 }
   0xd   :  { %24 = vsyncpa [#allocation16], 0 }
   0xe   :  { %26 = vsyncpa [#allocation16 + $0x1], 0  ;;  %s1330_s24 = smov 0   ;;  %s1332_s25 = smov 0  }
   0xf   :  { %s1334_s26 = smov 0   ;;  %s1336_s27 = smov 0  }
  0x10   :  { %s1338_s28 = smov 0   ;;  %s1340_s29 = smov 0  }
  0x11 LB: > { %1713 = sst [smem:[#allocation24_spill]] %s1271_s28  ;;  %s1361_s30 = sadd.s32 4294967295, %s1275_s29   ;;  %s1275_s29 = sphi %s1340_s29, %s32_s29   ;;  %s1271_s28 = sphi %s1338_s28, %s1740_s28   ;;  %s1267_s27 = sphi %s1336_s27, %s1739_s27   ;;  %s1263_s26 = sphi %s1334_s26, %s1743_s26   ;;  %s1259_s25 = sphi %s1332_s25, %s1742_s25   ;;  %s1255_s24 = sphi %s1330_s24, %s1741_s24  }
  0x12   : > { %p749_p0 = scmp.ge.s32.totalorder %s1275_s29, 1  ;;  %p1703_p1 = scmp.eq.s32.totalorder %s1361_s30, 0 }
  0x13   : > { %p239_p2 = scmp.lt.s32.totalorder %s1275_s29, 3  ;;  %s1277_s9 = smov [#allocation8]  }
  0x14   : > { %s252_s10 = sshll.u32 %s1277_s9, 4  ;;  %s1278_s11 = smov [#allocation9]   ;;  %s253_s10 = int_to_ptr.vmem [resolvable:$true] %s252_s10 }
  0x15   : > { %p1366_p3 = pnand %p749_p0, %p239_p2  ;;  %s263_s12 = sshll.u32 %s1278_s11, 4  ;;  %s1379_s12 = int_to_ptr.vmem [resolvable:$true] %s263_s12 }
  0x16   : > { %s1279_s14 = smov [#allocation11]   ;;  %s1716_s2 = sld [smem:[#allocation26_spill]] }
  0x17   : > { %s1714_s8 = scalar_select %p1366_p3, 1, 0 }
  0x18   : > { %p877_p5 = pneg %p1366_p3  ;;  %s273_s15 = sshll.u32 %s1279_s14, 4  ;;  %s1381_s15 = int_to_ptr.vmem [resolvable:$true] %s273_s15 }
  0x1a   : > { %p1375_p6 = pnand %p877_p5, %p1703_p1 }
  0x1c   : > { %s973_s18 = scalar_lea.hbm %s1716_s2, 16  ;;  %p1391_p8 = pneg %p1375_p6 }
  0x1d   : > { %p974_p7 = scmp.ne.s32.totalorder %s1716_s2, %s973_s18  ;;  %p980_p11 = scmp.lt.u32.totalorder %s973_s18, %s1716_s2 }
  0x1f   : > { %p976_p9 = pnand %p1391_p8, %p974_p7 }
  0x21   : > { %p977_p10 = pneg %p976_p9 }
  0x23   : > { %p982_p12 = pnand %p980_p11, %p977_p10 }
  0x25   : > { %985 = shalt.err (!%p982_p12)
}
  0x26   : > { %s986_s9 = scalar_lea.vmem %s253_s10, 16  ;;  %s993_s11 = scalar_lea.vmem %s253_s10, 32 }
  0x27   : > { %p987_p13 = scmp.ne.s32.totalorder %s253_s10, %s986_s9  ;;  %p994_p5 = scmp.lt.s32.totalorder %s253_s10, %s253_s10 }
  0x28   : > { %p995_p4 = scmp.lt.s32.totalorder %s993_s11, %s986_s9 }
  0x29   : > { %p989_p0 = pnand %p987_p13, %p1391_p8 }
  0x2a   : > { %p996_p1 = por %p995_p4, %p994_p5 }
  0x2b   : > { %p990_p2 = pneg %p989_p0 }
  0x2d   : > { %p997_p3 = pnand %p996_p1, %p990_p2 }
  0x2f   : > { %1000 = shalt.err (!%p997_p3)
}
  0x30   : > { %880 = dma.hbm_to_vmem [thread:$0]  (!%p1375_p6), %s1716_s2, 16, %s253_s10, [#allocation7]  }
  0x31   : > { %s1718_s3 = sld [smem:[#allocation27_spill]] }
  0x37   : > { %s1001_s19 = scalar_lea.hbm %s1718_s3, 16 }
  0x38   : > { %p1002_p7 = scmp.ne.s32.totalorder %s1718_s3, %s1001_s19  ;;  %p1008_p1 = scmp.lt.u32.totalorder %s1001_s19, %s1718_s3 }
  0x3a   : > { %p1004_p9 = pnand %p1002_p7, %p1391_p8 }
  0x3c   : > { %p1005_p4 = pneg %p1004_p9 }
  0x3e   : > { %p1010_p3 = pnand %p1008_p1, %p1005_p4 }
  0x40   : > { %1013 = shalt.err (!%p1010_p3)
}
  0x41   : > { %s1014_s10 = scalar_lea.vmem %s1379_s12, 16  ;;  %s1021_s11 = scalar_lea.vmem %s1379_s12, 32 }
  0x42   : > { %p1015_p10 = scmp.ne.s32.totalorder %s1379_s12, %s1014_s10  ;;  %p1022_p13 = scmp.lt.s32.totalorder %s1379_s12, %s1379_s12 }
  0x43   : > { %p1023_p0 = scmp.lt.s32.totalorder %s1021_s11, %s1014_s10 }
  0x44   : > { %p1017_p11 = pnand %p1015_p10, %p1391_p8 }
  0x45   : > { %p1024_p2 = por %p1023_p0, %p1022_p13 }
  0x46   : > { %p1018_p12 = pneg %p1017_p11 }
  0x48   : > { %p1025_p5 = pnand %p1024_p2, %p1018_p12 }
  0x4a   : > { %1028 = shalt.err (!%p1025_p5)
}
  0x4b   : > { %883 = dma.hbm_to_vmem [thread:$0]  (!%p1375_p6), %s1718_s3, 16, %s1379_s12, [#allocation10]  }
  0x4c   : > { %s1719_s4 = sld [smem:[#allocation28_spill]] }
  0x52   : > { %s1029_s19 = scalar_lea.hbm %s1719_s4, 2048 }
  0x53   : > { %p1030_p7 = scmp.ne.s32.totalorder %s1719_s4, %s1029_s19  ;;  %p1036_p1 = scmp.lt.u32.totalorder %s1029_s19, %s1719_s4 }
  0x55   : > { %p1032_p9 = pnand %p1030_p7, %p1391_p8 }
  0x57   : > { %p1033_p4 = pneg %p1032_p9 }
  0x59   : > { %p1038_p3 = pnand %p1036_p1, %p1033_p4 }
  0x5b   : > { %1041 = shalt.err (!%p1038_p3)
}
  0x5c   : > { %s1042_s12 = scalar_lea.vmem %s1381_s15, 2048  ;;  %p1050_p13 = scmp.lt.s32.totalorder %s1381_s15, %s1381_s15 }
  0x5d   : > { %p1043_p10 = scmp.ne.s32.totalorder %s1381_s15, %s1042_s12  ;;  %p1051_p0 = scmp.lt.s32.totalorder %s1042_s12, %s1042_s12 }
  0x5f   : > { %p1045_p11 = pnand %p1043_p10, %p1391_p8  ;;  %p1052_p2 = por %p1051_p0, %p1050_p13 }
  0x61   : > { %p1046_p12 = pneg %p1045_p11 }
  0x63   : > { %p1053_p5 = pnand %p1052_p2, %p1046_p12 }
  0x65   : > { %1056 = shalt.err (!%p1053_p5)
}
  0x66   : > { %s1280_s10 = smov 128   ;;  %s1281_s11 = smov 8  }
  0x67   : > { %886 = dma.hbm_to_vmem [thread:$0]  (!%p1375_p6), %s1719_s4, 2048, %s1381_s15, [#allocation10], %s1280_s10, %s1280_s10, %s1281_s11  }
  0x68   : > { %s1282_s17 = smov [#allocation12]   ;;  %s1720_s5 = sld [smem:[#allocation29_spill]] }
  0x69   : > { %s287_s18 = sshll.u32 %s1282_s17, 4  ;;  %s288_s18 = int_to_ptr.vmem [resolvable:$true] %s287_s18 }
  0x6e   : > { %s1057_s22 = scalar_lea.hbm %s1720_s5, 16 }
  0x6f   : > { %p1058_p7 = scmp.ne.s32.totalorder %s1720_s5, %s1057_s22  ;;  %p1064_p1 = scmp.lt.u32.totalorder %s1057_s22, %s1720_s5 }
  0x71   : > { %p1060_p9 = pnand %p1058_p7, %p1391_p8 }
  0x73   : > { %p1061_p4 = pneg %p1060_p9 }
  0x75   : > { %p1066_p3 = pnand %p1064_p1, %p1061_p4 }
  0x77   : > { %1069 = shalt.err (!%p1066_p3)
}
  0x78   : > { %s1070_s15 = scalar_lea.vmem %s288_s18, 16  ;;  %s1077_s10 = scalar_lea.vmem %s288_s18, 32 }
  0x79   : > { %p1071_p10 = scmp.ne.s32.totalorder %s288_s18, %s1070_s15  ;;  %p1078_p13 = scmp.lt.s32.totalorder %s288_s18, %s288_s18 }
  0x7a   : > { %p1079_p0 = scmp.lt.s32.totalorder %s1077_s10, %s1070_s15 }
  0x7b   : > { %p1073_p11 = pnand %p1071_p10, %p1391_p8 }
  0x7c   : > { %p1080_p2 = por %p1079_p0, %p1078_p13 }
  0x7d   : > { %p1074_p12 = pneg %p1073_p11 }
  0x7f   : > { %p1081_p5 = pnand %p1080_p2, %p1074_p12 }
  0x81   : > { %1084 = shalt.err (!%p1081_p5)
}
  0x82   : > { %889 = dma.hbm_to_vmem [thread:$0]  (!%p1375_p6), %s1720_s5, 16, %s288_s18, [#allocation13]  }
  0x83   : > { %s748_s2 = sadd.s32 4294967294, %s1275_s29   ;;  %s44_s21 = sadd.s32 1, %s1271_s28 }
  0x84   : > { %p46_p8 = scmp.ge.s32.totalorder %s44_s21, 2  ;;  %s51_s13 = sadd.s32 1, %s1263_s26 }
  0x85   : > { %p58_p7 = scmp.ne.s32.totalorder %s1263_s26, %s1259_s25  ;;  %p59_p9 = scmp.eq.s32.totalorder %s1275_s29, 0 }
  0x86   : > { %s1745_s21 = smov (%p46_p8, %s44_s21), 0  ;;  %p64_p1 = scmp.ne.s32.totalorder %s1259_s25, %s1255_s24 }
  0x87   : > { %1721 = sst [smem:[#allocation25_spill]] %s1745_s21  ;;  %p1480_p4 = por %p59_p9, %p58_p7 }
  0x88   : > { %s48_s17 = ssub.s32 %s1271_s28, %s1745_s21  ;;  %p200_p6 = scmp.eq.s32.totalorder %s1361_s30, 1 }
  0x89   : > { %p49_p3 = scmp.eq.s32.totalorder %s48_s17, 0  ;;  %p1723_p10 = scmp.eq.s32.totalorder %s1361_s30, 0 }
  0x8a   : > { %p1495_p12 = por %p200_p6, %p58_p7  ;;  %p206_p13 = scmp.eq.s32.totalorder %s748_s2, 1 }
  0x8b   : > { %p1491_p11 = por %p1723_p10, %p64_p1  ;;  %p908_p2 = scmp.lt.s32.totalorder %s1275_s29, 2 }
  0x8c   : > { %s1725_s19 = scalar_select %p1495_p12, 1, 0 }
  0x8d   : > { %s1724_s18 = scalar_select %p1491_p11, 1, 0 }
  0x8e   : > { %s1500_s20 = scalar_select %p49_p3, %s1263_s26, %s51_s13  }
  0x8f   : > { %p1502_p0 = por %p206_p13, %p64_p1  ;;  %s298_s23 = sand.u32 1, %s1263_s26  }
  0x90   : > { %s756_s9 = sshll.u32 %s1271_s28, 7  ;;  %s1509_s12 = sshll.u32 %s298_s23, 3 }
  0x91   : > { %s1726_s22 = scalar_select %p1502_p0, 1, 0 }
  0x92   : > { %s1514_s11 = scalar_lea.hbm %s1695_s0, %s756_s9  ;;  %s302_s14 = scalar_lea.vmem [#allocation3], %s1509_s12 }
  0x93   : > { %s309_s2 = sshll.u32 %s302_s14, 4  ;;  %p1519_p5 = pnand %p908_p2, %p1480_p4  ;;  %s1523_s2 = int_to_ptr.vmem [resolvable:$true] %s309_s2 }
  0x94   : > { %s1528_s10 = scalar_lea.hbm %s1696_s1, %s756_s9  ;;  %s299_s3 = scalar_lea.sflag [#allocation4], %s298_s23 }
  0x95   : > { %s1085_s4 = scalar_lea.hbm %s1514_s11, 128  ;;  %p1087_p7 = pneg %p1519_p5 }
  0x96   : > { %p1086_p8 = scmp.ne.s32.totalorder %s1514_s11, %s1085_s4  ;;  %s1090_s5 = scalar_lea.hbm %s1695_s0, 256 }
  0x97   : > { %p1091_p1 = scmp.lt.u32.totalorder %s1514_s11, %s1695_s0  ;;  %p1092_p6 = scmp.lt.u32.totalorder %s1090_s5, %s1085_s4 }
  0x98   : > { %p1088_p9 = pnand %p1087_p7, %p1086_p8  ;;  %p1094_p10 = scmp.lt.u32.totalorder %s1085_s4, %s1514_s11 }
  0x99   : > { %p1093_p3 = por %p1092_p6, %p1091_p1 }
  0x9a   : > { %p1089_p4 = pneg %p1088_p9 }
  0x9b   : > { %p1095_p13 = por %p1094_p10, %p1093_p3 }
  0x9d   : > { %p1096_p2 = pnand %p1095_p13, %p1089_p4 }
  0x9f   : > { %1099 = shalt.err (!%p1096_p2)
}
  0xa0   : > { %s1100_s23 = scalar_lea.vmem %s1523_s2, 128  ;;  %s1283_s9 = smov [#allocation3]  }
  0xa1   : > { %p1101_p8 = scmp.ne.s32.totalorder %s1523_s2, %s1100_s23  ;;  %s1105_s17 = sshll.u32 %s1283_s9, 4  ;;  %s1106_s17 = int_to_ptr.vmem [resolvable:$false] %s1105_s17 }
  0xa2   : > { %s1107_s28 = scalar_lea.vmem %s1106_s17, 256  ;;  %p1108_p12 = scmp.lt.s32.totalorder %s1523_s2, %s1106_s17 }
  0xa3   : > { %p1103_p9 = pnand %p1101_p8, %p1087_p7  ;;  %p1109_p1 = scmp.lt.s32.totalorder %s1107_s28, %s1100_s23 }
  0xa5   : > { %p1104_p0 = pneg %p1103_p9  ;;  %p1110_p6 = por %p1109_p1, %p1108_p12 }
  0xa7   : > { %p1111_p3 = pnand %p1110_p6, %p1104_p0 }
  0xa9   : > { %1114 = shalt.err (!%p1111_p3)
}
  0xaa   : > { %893 = dma.hbm_to_vmem [thread:$0]  (!%p1519_p5), %s1514_s11, 128, %s1523_s2, %s299_s3  }
  0xab   : > { %s316_s4 = sand.u32 1, %s1275_s29   ;;  %s320_s5 = scalar_lea.vmem [#allocation6], %s1509_s12 }
  0xac   : > { %s327_s21 = sshll.u32 %s320_s5, 4  ;;  %s317_s15 = scalar_lea.sflag [#allocation7], %s316_s4  ;;  %s328_s21 = int_to_ptr.vmem [resolvable:$true] %s327_s21 }
  0xad   : > { %s1115_s16 = scalar_lea.hbm %s1528_s10, 128  ;;  %s1120_s9 = scalar_lea.hbm %s1696_s1, 256 }
  0xae   : > { %p1116_p12 = scmp.ne.s32.totalorder %s1528_s10, %s1115_s16  ;;  %p1121_p10 = scmp.lt.u32.totalorder %s1528_s10, %s1696_s1 }
  0xaf   : > { %p1122_p13 = scmp.lt.u32.totalorder %s1120_s9, %s1115_s16  ;;  %p1124_p8 = scmp.lt.u32.totalorder %s1115_s16, %s1528_s10 }
  0xb0   : > { %p1118_p0 = pnand %p1116_p12, %p1087_p7 }
  0xb1   : > { %p1123_p2 = por %p1122_p13, %p1121_p10 }
  0xb2   : > { %p1119_p4 = pneg %p1118_p0 }
  0xb3   : > { %p1125_p9 = por %p1124_p8, %p1123_p2 }
  0xb5   : > { %p1126_p1 = pnand %p1125_p9, %p1119_p4 }
  0xb7   : > { %1129 = shalt.err (!%p1126_p1)
}
  0xb8   : > { %s1130_s3 = scalar_lea.vmem %s328_s21, 128  ;;  %s1284_s12 = smov [#allocation6]  }
  0xb9   : > { %p1131_p6 = scmp.ne.s32.totalorder %s328_s21, %s1130_s3  ;;  %s1135_s11 = sshll.u32 %s1284_s12, 4  ;;  %s1136_s11 = int_to_ptr.vmem [resolvable:$false] %s1135_s11 }
  0xba   : > { %s1137_s2 = scalar_lea.vmem %s1136_s11, 256  ;;  %p1138_p0 = scmp.lt.s32.totalorder %s328_s21, %s1136_s11 }
  0xbb   : > { %p1133_p3 = pnand %p1131_p6, %p1087_p7  ;;  %p1139_p11 = scmp.lt.s32.totalorder %s1137_s2, %s1130_s3 }
  0xbd   : > { %p1134_p12 = pneg %p1133_p3  ;;  %p1140_p10 = por %p1139_p11, %p1138_p0 }
  0xbf   : > { %p1141_p13 = pnand %p1140_p10, %p1134_p12 }
  0xc1   : > { %1144 = shalt.err (!%p1141_p13)
}
  0xc2   : > { %896 = dma.hbm_to_vmem [thread:$0]  (!%p1519_p5), %s1528_s10, 128, %s328_s21, %s317_s15  }
  0xc3   : > { %p1728_p4 = scmp.ne.s32.totalorder %s1714_s8, 0 }
  0xc4   : > { %s1579_s4 = sand.u32 (!%p1728_p4), 1, %s1259_s25   ;;  %p1729_p11 = scmp.ne.s32.totalorder (!%p1728_p4), %s1724_s18, 0 }
  0xc5   : > { %336 = sbr.rel (%p1728_p4) target bundleno = 761 (0x2f9), region = 44  ;;  %s1582_s5 = sshll.u32 (!%p1728_p4), %s1579_s4, 3 }
  0xc6   : > { %s339_s16 = scalar_lea.sflag (!%p1728_p4), [#allocation4], %s1579_s4  ;;  %s342_s14 = scalar_lea.vmem (!%p1728_p4), [#allocation3], %s1582_s5 }
  0xcc   : > { %1226 = dma.done.wait (%p1729_p11), %s339_s16, 128  }
  0xcd   : > { %1228 = vsyncadd (%p1729_p11), %s339_s16, 4294967168  ;;  %s347_s8 = sand.u32 1, %s1361_s30   ;;  %s351_s10 = scalar_lea.vmem [#allocation6], %s1582_s5 }
  0xce   : > { %s348_s13 = scalar_lea.sflag [#allocation7], %s347_s8 }
  0xcf   : > { %1230 = dma.done.wait (%p1729_p11), %s348_s13, 128  }
  0xd0   : > { %1232 = vsyncadd (%p1729_p11), %s348_s13, 4294967168  ;;  %p1730_p5 = scmp.eq.s32.totalorder %s1361_s30, 0 }
  0xd2   : > { %1234 = dma.done.wait (%p1730_p5), [#allocation7], 16   ;;  %p1731_p7 = pmov %p1730_p5 }
  0xd3   : > { %p1732_p2 = pmov %p1730_p5 }
  0xd4   : > { %1236 = vsyncadd (%p1731_p7), [#allocation7], 4294967280 }
  0xd5   : > { %1238 = dma.done.wait (%p1732_p2), [#allocation10], 2064   ;;  %p1733_p8 = pmov %p1732_p2 }
  0xd6   : > { %p1734_p9 = pmov %p1732_p2 }
  0xd7   : > { %1240 = vsyncadd (%p1733_p8), [#allocation10], 4294965232 }
  0xd8   : > { %1242 = dma.done.wait (%p1734_p9), [#allocation13], 16   ;;  %p1735_p1 = pmov %p1732_p2 }
  0xd9   : > { %v412_v0 = vld [vmem:[%s342_s14] sm:$0xff]  ;;  %v413_v1 = vld [vmem:[%s351_s10] sm:$0xff]  ;;  %v1285_v6 = vmov 0.0|0.0   ;;  %vm1286_vm0 = vmmov 0   ;;  %v1287_v25 = vmov 0.0   ;;  %s773_s30 = sshll.u32 %s1267_s27, 7 }
  0xda   : > { %1244 = vsyncadd (%p1735_p1), [#allocation13], 4294967280  ;;  %v1608_v2 = vadd.f32 %v413_v1, %v412_v0  ;;  %v448_v3 = vld [vmem:[#allocation11] sm:$0xff]  ;;  %v449_v4 = vld [vmem:[#allocation11 + $0x8] sm:$0xff]  ;;  %829 = vmatprep.subr.bf16.mxu0 %v1285_v6  ;;  %826 = vmatprep.mubr.msk.f32.mxu0 %vm1286_vm0, %v1287_v25  ;;  %s407_s18 = scalar_lea.vmem [#allocation15], %s1582_s5  ;;  %s1620_s23 = scalar_lea.hbm %s1702_s7, %s773_s30 }
  0xdb   : > { %v450_v5 = vld [vmem:[#allocation11 + $0x10] sm:$0xff]  ;;  %v830_v7 = vpack.c.bf16 %v449_v4, %v448_v3  ;;  %v451_v8 = vld [vmem:[#allocation11 + $0x18] sm:$0xff]  ;;  %v452_v14 = vld [vmem:[#allocation11 + $0x20] sm:$0xff]  ;;  %s575_s9 = sshll.u32 %s407_s18, 4  ;;  %s548_s17 = scalar_lea.sflag [#allocation16], %s1579_s4  ;;  %s576_s9 = int_to_ptr.vmem [resolvable:$true] %s575_s9 }
  0xdc   : > { %416 = vadd.xlane.f32.xlu0 %v1608_v2  ;;  %v833_v9 = vpack.c.bf16 %v451_v8, %v450_v5  ;;  %v453_v15 = vld [vmem:[#allocation11 + $0x28] sm:$0xff]  ;;  %v454_v17 = vld [vmem:[#allocation11 + $0x30] sm:$0xff]  ;;  %v455_v18 = vld [vmem:[#allocation11 + $0x38] sm:$0xff]  ;;  %415 = vst [vmem:[%s407_s18] sm:$0xff] %v1608_v2  ;;  %s1145_s28 = scalar_lea.vmem %s576_s9, 128  ;;  %p1736_p3 = scmp.ne.s32.totalorder %s1725_s19, 0 }
  0xdd   : > { %831 = vmatpush3.bf16.msra.mxu0 %v830_v7  ;;  %v836_v16 = vpack.c.bf16 %v453_v15, %v452_v14  ;;  %v839_v19 = vpack.c.bf16 %v455_v18, %v454_v17  ;;  %v456_v20 = vld [vmem:[#allocation11 + $0x40] sm:$0xff]  ;;  %v457_v21 = vld [vmem:[#allocation11 + $0x48] sm:$0xff]  ;;  %v458_v23 = vld [vmem:[#allocation11 + $0x50] sm:$0xff]  ;;  %p1146_p6 = scmp.ne.s32.totalorder %s576_s9, %s1145_s28  ;;  %s1288_s3 = smov [#allocation15]  }
  0xde   : > { %832 = vmatprep.subr.bf16.mxu0 %v1285_v6  ;;  %v842_v22 = vpack.c.bf16 %v457_v21, %v456_v20  ;;  %v459_v24 = vld [vmem:[#allocation11 + $0x58] sm:$0xff]  ;;  %v460_v27 = vld [vmem:[#allocation11 + $0x60] sm:$0xff]  ;;  %v461_v28 = vld [vmem:[#allocation11 + $0x68] sm:$0xff]  ;;  %s1149_s12 = sshll.u32 %s1288_s3, 4  ;;  %s1150_s12 = int_to_ptr.vmem [resolvable:$false] %s1149_s12 }
  0xdf   : > { %v845_v26 = vpack.c.bf16 %v459_v24, %v458_v23  ;;  %v848_v29 = vpack.c.bf16 %v461_v28, %v460_v27  ;;  %v462_v30 = vld [vmem:[#allocation11 + $0x70] sm:$0xff]  ;;  %v463_v31 = vld [vmem:[#allocation11 + $0x78] sm:$0xff]  ;;  %p1147_p12 = pnand %p1146_p6, %p1736_p3  ;;  %s1151_s11 = scalar_lea.vmem %s1150_s12, 256 }
  0xe0   : > { %v851_v32 = vpack.c.bf16 %v463_v31, %v462_v30  ;;  %v768_v40 = vld [vmem:[#allocation8] ss:$0 sm:$0xff]  ;;  %v769_v42 = vld [vmem:[#allocation9] ss:$0 sm:$0xff]  ;;  %p1152_p10 = scmp.lt.s32.totalorder %s576_s9, %s1150_s12  ;;  %p1153_p13 = scmp.lt.s32.totalorder %s1151_s11, %s1145_s28 }
  0xe1   : > { %834 = vmatpush3.bf16.msra.mxu0 %v833_v9  ;;  %p1148_p0 = pneg %p1147_p12 }
  0xe2   : > { %835 = vmatprep.subr.bf16.mxu0 %v1285_v6  ;;  %p1154_p4 = por %p1153_p13, %p1152_p10 }
  0xe4   : > { %p1155_p11 = pnand %p1154_p4, %p1148_p0 }
  0xe5   : > { %837 = vmatpush3.bf16.msra.mxu0 %v836_v16 }
  0xe6   : > { %838 = vmatprep.subr.bf16.mxu0 %v1285_v6 }
  0xe9   : > { %840 = vmatpush3.bf16.msra.mxu0 %v839_v19 }
  0xea   : > { %841 = vmatprep.subr.bf16.mxu0 %v1285_v6 }
  0xed   : > { %843 = vmatpush3.bf16.msra.mxu0 %v842_v22 }
  0xee   : > { %844 = vmatprep.subr.bf16.mxu0 %v1285_v6 }
  0xf1   : > { %846 = vmatpush3.bf16.msra.mxu0 %v845_v26 }
  0xf2   : > { %847 = vmatprep.subr.bf16.mxu0 %v1285_v6 }
  0xf5   : > { %849 = vmatpush3.bf16.msra.mxu0 %v848_v29 }
  0xf6   : > { %850 = vmatprep.subr.bf16.mxu0 %v1285_v6 }
  0xf9   : > { %852 = vmatpush3.bf16.msra.mxu0 %v851_v32 }
 0x169   : > { %v417_v10 = vpop.xlane.xlu0 %416 }
 0x16a   : > { %v418_v11 = vmul.f32 0.03125, %v417_v10 }
 0x16c   : > { %v419_v12 = vsub.f32 %v1608_v2, %v418_v11  ;;  %v423_v33 = vmul.f32 96.0, %v418_v11 }
 0x16e   : > { %v420_v13 = vmul.f32 %v419_v12, %v419_v12  ;;  %v424_v34 = vmul.f32 %v423_v33, %v418_v11 }
 0x170   : > { %421 = vadd.xlane.f32.xlu0 %v420_v13 }
 0x1fd   : > { %v422_v35 = vpop.xlane.xlu0 %421 }
 0x1fe   : > { %v425_v36 = vsub.f32 %v422_v35, %v424_v34 }
 0x200   : > { %v426_v37 = vmul.f32 0.03125, %v425_v36 }
 0x202   : > { %v427_v38 = vadd.f32 1e-05, %v426_v37 }
 0x204   : > { %971 = vrsqrt.f32 %v427_v38 }
 0x20e   : > { %v972_v39 = vpop.eup %971 }
 0x20f   : > { %v429_v41 = vmul.f32 %v972_v39, %v419_v12 }
 0x211   : > { %v437_v43 = vmul.f32 %v768_v40, %v429_v41 }
 0x213   : > { %v445_v44 = vadd.f32 %v769_v42, %v437_v43 }
 0x215   : > { %827 = vmatmul.mubr.f32.vlgmr.msra.gmra.mrb[0].mxu0 %v445_v44 }
 0x216   : > { %1158 = shalt.err (!%p1155_p11)
}
 0x217   : > { %s1159_s2 = scalar_lea.hbm %s1620_s23, 128  ;;  %s1163_s8 = scalar_lea.hbm %s1702_s7, 256 }
 0x218   : > { %p1160_p5 = scmp.ne.s32.totalorder %s1620_s23, %s1159_s2  ;;  %p1164_p8 = scmp.lt.u32.totalorder %s1620_s23, %s1702_s7 }
 0x219   : > { %p1165_p9 = scmp.lt.u32.totalorder %s1163_s8, %s1159_s2  ;;  %p1167_p6 = scmp.lt.u32.totalorder %s1159_s2, %s1620_s23 }
 0x21a   : > { %p1161_p7 = pnand %p1160_p5, %p1736_p3 }
 0x21b   : > { %p1166_p1 = por %p1165_p9, %p1164_p8 }
 0x21c   : > { %p1162_p2 = pneg %p1161_p7 }
 0x21d   : > { %p1168_p12 = por %p1167_p6, %p1166_p1 }
 0x21f   : > { %p1169_p0 = pnand %p1168_p12, %p1162_p2 }
 0x221   : > { %1172 = shalt.err (!%p1169_p0)
}
 0x222   : > { %874 = dma.vmem_to_hbm [thread:$0]  (%p1736_p3), %s576_s9, 128, %s1620_s23, %s548_s17   ;;  %v770_v45 = vld [vmem:[#allocation12] ss:$0 sm:$0xff] }
 0x223   : > { %s400_s18 = scalar_lea.vmem [#allocation14], %s1582_s5  ;;  %s1646_s3 = scalar_lea.hbm %s1701_s6, %s773_s30 }
 0x224   : > { %s562_s21 = sshll.u32 %s400_s18, 4  ;;  %s543_s12 = scalar_lea.sflag [#allocation5], %s1579_s4  ;;  %s1648_s21 = int_to_ptr.vmem [resolvable:$true] %s562_s21 }
 0x225   : > { %s1173_s23 = scalar_lea.vmem %s1648_s21, 128  ;;  %s1289_s5 = smov [#allocation14]  }
 0x226   : > { %p1174_p10 = scmp.ne.s32.totalorder %s1648_s21, %s1173_s23  ;;  %s1177_s9 = sshll.u32 %s1289_s5, 4  ;;  %s1178_s9 = int_to_ptr.vmem [resolvable:$false] %s1177_s9 }
 0x227   : > { %s1179_s27 = scalar_lea.vmem %s1178_s9, 256  ;;  %p1180_p11 = scmp.lt.s32.totalorder %s1648_s21, %s1178_s9 }
 0x228   : > { %p1175_p13 = pnand %p1174_p10, %p1736_p3  ;;  %p1181_p5 = scmp.lt.s32.totalorder %s1179_s27, %s1173_s23 }
 0x22a   : > { %p1176_p4 = pneg %p1175_p13  ;;  %p1182_p7 = por %p1181_p5, %p1180_p11 }
 0x22c   : > { %p1183_p2 = pnand %p1182_p7, %p1176_p4 }
 0x2e8   : > { %v537_v46 = vpop.f32.mrb[0].mxu0 }
 0x2e9   : > { %v538_v47 = vadd.f32 %v770_v45, %v537_v46  ;;  %v828_v48 = vpop.f32.mrb[1].mxu0 }
 0x2eb   : > { %541 = vst [vmem:[%s400_s18] sm:$0xff] %v538_v47 }
 0x2ec   : > { %1186 = shalt.err (!%p1183_p2)
}
 0x2ed   : > { %s1187_s4 = scalar_lea.hbm %s1646_s3, 128  ;;  %s1191_s11 = scalar_lea.hbm %s1701_s6, 256 }
 0x2ee   : > { %p1188_p8 = scmp.ne.s32.totalorder %s1646_s3, %s1187_s4  ;;  %p1192_p6 = scmp.lt.u32.totalorder %s1646_s3, %s1701_s6 }
 0x2ef   : > { %p1193_p12 = scmp.lt.u32.totalorder %s1191_s11, %s1187_s4  ;;  %p1195_p10 = scmp.lt.u32.totalorder %s1187_s4, %s1646_s3 }
 0x2f0   : > { %p1189_p9 = pnand %p1188_p8, %p1736_p3 }
 0x2f1   : > { %p1194_p0 = por %p1193_p12, %p1192_p6 }
 0x2f2   : > { %p1190_p1 = pneg %p1189_p9 }
 0x2f3   : > { %p1196_p13 = por %p1195_p10, %p1194_p0 }
 0x2f5   : > { %p1197_p4 = pnand %p1196_p13, %p1190_p1 }
 0x2f7   : > { %1200 = shalt.err (!%p1197_p4)
}
 0x2f8   : > { %873 = dma.vmem_to_hbm [thread:$0]  (%p1736_p3), %s1648_s21, 128, %s1646_s3, %s543_s12  }
 0x2f9 PF: > { %s587_s14 = sand.u32 1, %s1255_s24   ;;  %p1737_p11 = scmp.ne.s32.totalorder %s1726_s22, 0 }
 0x2fa   : > { %p1738_p5 = scmp.ge.s32.totalorder %s1275_s29, 2  ;;  %s588_s8 = scalar_lea.sflag [#allocation5], %s587_s14 }
 0x2fc   : > { %p898_p7 = pnand %p1738_p5, %p1737_p11 }
 0x2fe   : > { %1246 = dma.done.wait (!%p898_p7), %s588_s8, 128  }
 0x2ff   : > { %1248 = vsyncadd (!%p898_p7), %s588_s8, 4294967168  ;;  %s597_s13 = scalar_lea.sflag [#allocation16], %s587_s14 }
 0x300   : > { %1250 = dma.done.wait (!%p898_p7), %s597_s13, 128  }
 0x301   : > { %1252 = vsyncadd (!%p898_p7), %s597_s13, 4294967168  ;;  %s32_s29 = sadd.s32 1, %s1275_s29   ;;  %s1739_s27 = sld [smem:[#allocation24_spill]] }
 0x302   : > { %p29_p2 = scmp.ge.s32.totalorder %s32_s29, 4   ;;  %s1740_s28 = sld [smem:[#allocation25_spill]] }
 0x303   : > { %s1741_s24 = smov %s1259_s25  ;;  %s1742_s25 = smov %s1263_s26 }
 0x304   : > { %s1743_s26 = smov %s1500_s20  ;;  %31 = sbr.rel (!%p29_p2) target bundleno = 17 (0x11), region = 139 }
 0x30b   :  { %602 = vsyncpa [#allocation4], 1 }
 0x30c   :  { %604 = vsyncpa [#allocation4 + $0x1], 1 }
 0x30d   :  { %605 = vsyncpa [#allocation7], 1 }
 0x30e   :  { %607 = vsyncpa [#allocation7 + $0x1], 1 }
 0x30f   :  { %608 = vsyncpa [#allocation10], 1 }
 0x310   :  { %609 = vsyncpa [#allocation13], 1 }
 0x311   :  { %610 = vsyncpa [#allocation5], 1 }
 0x312   :  { %612 = vsyncpa [#allocation5 + $0x1], 1 }
 0x313   :  { %613 = vsyncpa [#allocation16], 1 }
 0x314   :  { %615 = vsyncpa [#allocation16 + $0x1], 1 }

</bundles_post_ra>
